<compile_context>
chip_gen: v7x
topology: tpu7x:2x2x1
jax: 0.10.0
libtpu: 0.0.40
codegen_flags: <defaults>
</compile_context>

<pallas_src>
import functools
import math

import jax
import jax.numpy as jnp
from jax.experimental import pallas as pl
from jax.experimental.pallas import tpu as pltpu

BN_EPS = 1e-5
LAYERS = (3, 8, 36, 3)          # resnet152
PLANES = (64, 128, 256, 512)
STRIDES = (1, 2, 2, 2)
EXPANSION = 4

MAX_TM = 256                    # sublane-side tile cap (keeps >=2 parallel M blocks when M >= 512)
MAX_TN = 256                    # lane-side tile cap: matches the 2x256x256 MXU on v6e/v7x
MAX_TK = 2048                   # reduction tile cap: most convs become a single K step
VMEM_LIMIT_BYTES = 32 * 1024 * 1024   # tile footprints here are ~<8 MiB; safe on all chips


def _round_up(x, m):
    return (x + m - 1) // m * m


def _pick_tile(dim, cap, mult):
    """Largest multiple of `mult` dividing `dim` (a multiple of `mult`) that is <= cap."""
    if dim <= cap:
        return dim
    best = mult
    t = mult
    while t <= cap:
        if dim % t == 0:
            best = t
        t += mult
    return best


def _m_tiling(M):
    # Second-minor block dim must be a multiple of 16 (bf16 sublane packing) or the
    # full array extent; small M therefore uses one full-extent block, zero padding.
    if M <= MAX_TM:
        return M, M
    Mp = _round_up(M, 16)
    return Mp, _pick_tile(Mp, MAX_TM, 16)


def _n_tiling(N):
    if N % 128 == 0:
        return N, _pick_tile(N, MAX_TN, 128)
    return N, N                  # full-extent (lane-masked) block, no padding


# ----------------------------------------------------------------------------
# Pallas kernels
# ----------------------------------------------------------------------------
def _fused_matmul_kernel(x_ref, w_ref, b_ref, o_ref, acc_ref, *, relu):
    k = pl.program_id(2)

    @pl.when(k == 0)
    def _():
        acc_ref[...] = jnp.zeros_like(acc_ref)

    acc_ref[...] += jnp.dot(x_ref[...], w_ref[...],
                            preferred_element_type=jnp.float32)

    @pl.when(k == pl.num_programs(2) - 1)
    def _():
        y = acc_ref[...] + b_ref[...]
        if relu:
            y = jnp.maximum(y, 0.0)
        o_ref[...] = y.astype(o_ref.dtype)


def _fused_matmul_res_kernel(x_ref, w_ref, b_ref, r_ref, o_ref, acc_ref, *, relu):
    k = pl.program_id(2)

    @pl.when(k == 0)
    def _():
        acc_ref[...] = jnp.zeros_like(acc_ref)

    acc_ref[...] += jnp.dot(x_ref[...], w_ref[...],
                            preferred_element_type=jnp.float32)

    @pl.when(k == pl.num_programs(2) - 1)
    def _():
        y = acc_ref[...] + b_ref[...] + r_ref[...].astype(jnp.float32)
        if relu:
            y = jnp.maximum(y, 0.0)
        o_ref[...] = y.astype(o_ref.dtype)


def _conv3x3_tap_kernel(x_ref, w_ref, b_ref, o_ref, acc_ref, *, oh, ow, relu):
    # x_ref: (Nb, oh+2, ow+2, C) whole zero-padded activation, VMEM resident.
    # w_ref: (9, C, TN) tap-major folded weights; b_ref: (1, TN) f32.
    nb = x_ref.shape[0]
    c = x_ref.shape[3]
    acc_ref[...] = jnp.zeros_like(acc_ref)
    for t in range(9):                       # static tap loop: shifted windows never leave VMEM
        di, dj = t // 3, t % 3
        xs = x_ref[:, di:di + oh, dj:dj + ow, :].reshape(nb * oh * ow, c)
        acc_ref[...] += jnp.dot(xs, w_ref[t], preferred_element_type=jnp.float32)
    y = acc_ref[...] + b_ref[...]
    if relu:
        y = jnp.maximum(y, 0.0)
    o_ref[...] = y.astype(o_ref.dtype)


def _max9_kernel(p_ref, o_ref):
    m = p_ref[0]
    for t in range(1, 9):
        m = jnp.maximum(m, p_ref[t])
    o_ref[...] = m


# ----------------------------------------------------------------------------
# Fused matmul (+bias [+residual] [+ReLU]) wrapper
# ----------------------------------------------------------------------------
def _matmul_call(x, w, b, r, *, relu, out_dtype):
    # x: (M, K) bf16, w: (K, N) bf16, b: (1, N) f32, r: (M, N) bf16 or None
    M, K = x.shape
    N = w.shape[1]
    # Only pad the reduction dim when it cannot be expressed as a clean block:
    # a 16-aligned K that fits in one block is used as a full-extent block (no copy).
    if (K % 16 != 0) or (K > MAX_TK and K % 128 != 0):
        Kp = _round_up(K, 128)
        x = jnp.pad(x, ((0, 0), (0, Kp - K)))
        w = jnp.pad(w, ((0, Kp - K), (0, 0)))
        K = Kp
    Mp, TM = _m_tiling(M)
    Np, TN = _n_tiling(N)                    # Np == N (never padded)
    TK = _pick_tile(K, MAX_TK, 128) if K % 128 == 0 else K
    if Mp != M:
        x = jnp.pad(x, ((0, Mp - M), (0, 0)))
        if r is not None:
            r = jnp.pad(r, ((0, Mp - M), (0, 0)))

    in_specs = [pl.BlockSpec((TM, TK), lambda i, j, k: (i, k)),
                pl.BlockSpec((TK, TN), lambda i, j, k: (k, j)),
                pl.BlockSpec((1, TN), lambda i, j, k: (0, j))]
    args = [x, w, b]
    if r is None:
        kernel = functools.partial(_fused_matmul_kernel, relu=relu)
    else:
        kernel = functools.partial(_fused_matmul_res_kernel, relu=relu)
        in_specs.append(pl.BlockSpec((TM, TN), lambda i, j, k: (i, j)))
        args.append(r)

    itemsize_out = jnp.dtype(out_dtype).itemsize
    bytes_accessed = (Mp * K * 2 + K * Np * 2 + Np * 4 + Mp * Np * itemsize_out
                      + (Mp * Np * 2 if r is not None else 0))
    out = pl.pallas_call(
        kernel,
        out_shape=jax.ShapeDtypeStruct((Mp, Np), out_dtype),
        grid_spec=pltpu.PrefetchScalarGridSpec(
            num_scalar_prefetch=0,
            grid=(Mp // TM, Np // TN, K // TK),
            in_specs=in_specs,
            out_specs=pl.BlockSpec((TM, TN), lambda i, j, k: (i, j)),
            scratch_shapes=[pltpu.VMEM((TM, TN), jnp.float32)]),
        compiler_params=pltpu.CompilerParams(
            dimension_semantics=("parallel", "parallel", "arbitrary"),
            vmem_limit_bytes=VMEM_LIMIT_BYTES),
        cost_estimate=pl.CostEstimate(flops=2 * Mp * Np * K, transcendentals=0,
                                      bytes_accessed=bytes_accessed),
    )(*args)
    if Mp != M:
        out = out[:M]
    return out


# ----------------------------------------------------------------------------
# Convolution wrappers (glue fused inside per-conv jit)
# ----------------------------------------------------------------------------
def _im2col(x, kh, kw, stride, pad):
    N, H, W, C = x.shape
    OH = (H + 2 * pad - kh) // stride + 1
    OW = (W + 2 * pad - kw) // stride + 1
    if pad:
        x = jnp.pad(x, ((0, 0), (pad, pad), (pad, pad), (0, 0)))
    if kh == 1 and kw == 1:
        cols = x[:, ::stride, ::stride, :]
        return cols.reshape(N * OH * OW, C), OH, OW
    cols = [x[:, i:i + stride * OH:stride, j:j + stride * OW:stride, :]
            for i in range(kh) for j in range(kw)]
    cols = jnp.stack(cols, axis=3)                       # (N, OH, OW, kh*kw, C)
    return cols.reshape(N * OH * OW, kh * kw * C), OH, OW


@functools.partial(jax.jit, static_argnames=("kh", "kw", "stride", "relu"))
def _conv_mat(x, w, b, *, kh, kw, stride, relu):
    Nb = x.shape[0]
    w = w.reshape(-1, w.shape[-1])
    pad = (kh - 1) // 2
    patches, OH, OW = _im2col(x, kh, kw, stride, pad)
    y = _matmul_call(patches, w, b, None, relu=relu, out_dtype=jnp.bfloat16)
    return y.reshape(Nb, OH, OW, w.shape[-1])


@functools.partial(jax.jit, static_argnames=("kh", "kw", "stride", "relu"))
def _conv_mat_res(x, w, b, r, *, kh, kw, stride, relu):
    Nb = x.shape[0]
    w = w.reshape(-1, w.shape[-1])
    pad = (kh - 1) // 2
    patches, OH, OW = _im2col(x, kh, kw, stride, pad)
    cout = w.shape[-1]
    y = _matmul_call(patches, w, b, r.reshape(Nb * OH * OW, cout),
                     relu=relu, out_dtype=jnp.bfloat16)
    return y.reshape(Nb, OH, OW, cout)


@functools.partial(jax.jit, static_argnames=("relu",))
def _conv3x3_s1_tap(x, w_taps, b, *, relu):
    # Direct 3x3/stride-1 conv: whole padded activation resident in VMEM, per-tap matmuls.
    # Width is right-padded (with zeros) to a 16 multiple so the in-kernel reshape
    # stays sublane-aligned for bf16; the extra output columns are discarded.
    Nb, H, W, C = x.shape
    cout = w_taps.shape[-1]
    Wp = _round_up(W, 16)
    xp = jnp.pad(x, ((0, 0), (1, 1), (1, 1 + (Wp - W)), (0, 0)))
    Np, TN = _n_tiling(cout)                 # Np == cout for ResNet channel counts
    M = Nb * H * Wp
    bytes_accessed = xp.size * 2 + w_taps.size * 2 + cout * 4 + M * cout * 2
    out = pl.pallas_call(
        functools.partial(_conv3x3_tap_kernel, oh=H, ow=Wp, relu=relu),
        out_shape=jax.ShapeDtypeStruct((M, cout), jnp.bfloat16),
        grid_spec=pltpu.PrefetchScalarGridSpec(
            num_scalar_prefetch=0,
            grid=(Np // TN,),
            in_specs=[pl.BlockSpec((Nb, H + 2, Wp + 2, C), lambda j: (0, 0, 0, 0)),
                      pl.BlockSpec((9, C, TN), lambda j: (0, 0, j)),
                      pl.BlockSpec((1, TN), lambda j: (0, j))],
            out_specs=pl.BlockSpec((M, TN), lambda j: (0, j)),
            scratch_shapes=[pltpu.VMEM((M, TN), jnp.float32)]),
        compiler_params=pltpu.CompilerParams(
            dimension_semantics=("parallel",),
            vmem_limit_bytes=VMEM_LIMIT_BYTES),
        cost_estimate=pl.CostEstimate(flops=2 * M * cout * 9 * C, transcendentals=0,
                                      bytes_accessed=bytes_accessed),
    )(xp, w_taps, b)
    out = out.reshape(Nb, H, Wp, cout)
    if Wp != W:
        out = out[:, :, :W, :]
    return out


def conv_bn(x, p, stride, relu, residual=None):
    """Conv + folded BN (+ residual) (+ ReLU).  Dispatches to tap or im2col path."""
    if p['kind'] == 'tap':
        if stride == 1 and residual is None:
            return _conv3x3_s1_tap(x, p['w'], p['b'], relu=relu)
        kh = kw = 3                          # safety fallback (not hit in this net)
    else:
        kh, kw = p['kh'], p['kw']
    if residual is None:
        return _conv_mat(x, p['w'], p['b'], kh=kh, kw=kw, stride=stride, relu=relu)
    return _conv_mat_res(x, p['w'], p['b'], residual,
                         kh=kh, kw=kw, stride=stride, relu=relu)


# ----------------------------------------------------------------------------
# Maxpool 3x3 / stride 2 / pad 1 (torchvision stem)
# ----------------------------------------------------------------------------
@jax.jit
def _maxpool_3x3_s2(x):
    N, H, W, C = x.shape
    k, stride, pad = 3, 2, 1
    OH = (H + 2 * pad - k) // stride + 1
    OW = (W + 2 * pad - k) // stride + 1
    xp = jnp.pad(x, ((0, 0), (pad, pad), (pad, pad), (0, 0)),
                 constant_values=float("-inf"))
    wins = [xp[:, i:i + stride * OH:stride, j:j + stride * OW:stride, :]
            for i in range(k) for j in range(k)]
    p = jnp.stack(wins, axis=0).reshape(9, N * OH * OW, C)
    M = N * OH * OW
    Mp, TM = _m_tiling(M)
    if Mp != M:
        p = jnp.pad(p, ((0, 0), (0, Mp - M), (0, 0)), constant_values=float("-inf"))
    out = pl.pallas_call(
        _max9_kernel,
        out_shape=jax.ShapeDtypeStruct((Mp, C), x.dtype),      # C kept at 64: full-dim block
        grid_spec=pltpu.PrefetchScalarGridSpec(
            num_scalar_prefetch=0,
            grid=(Mp // TM,),
            in_specs=[pl.BlockSpec((9, TM, C), lambda i: (0, i, 0))],
            out_specs=pl.BlockSpec((TM, C), lambda i: (i, 0))),
        compiler_params=pltpu.CompilerParams(
            dimension_semantics=("parallel",),
            vmem_limit_bytes=VMEM_LIMIT_BYTES),
    )(p)
    return out[:M].reshape(N, OH, OW, C)


# ----------------------------------------------------------------------------
# Classifier head (global avg pool + FC)
# ----------------------------------------------------------------------------
@jax.jit
def _head(x, fc_w, fc_b):
    pooled = jnp.mean(x.astype(jnp.float32), axis=(1, 2))       # AdaptiveAvgPool2d(1)
    return _matmul_call(pooled.astype(jnp.bfloat16), fc_w, fc_b, None,
                        relu=False, out_dtype=jnp.float32)


# ----------------------------------------------------------------------------
# Deterministic parameter construction (resnet152, BN folded, bf16 weights)
# ----------------------------------------------------------------------------
def _make_conv_bn(key, kh, kw, cin, cout, *, tap=False):
    kwt, kg, kb = jax.random.split(key, 3)
    fan_in = kh * kw * cin
    w = jax.random.normal(kwt, (kh, kw, cin, cout), jnp.float32) * math.sqrt(2.0 / fan_in)
    gamma = 1.0 + 0.01 * jax.random.normal(kg, (cout,), jnp.float32)
    beta = 0.01 * jax.random.normal(kb, (cout,), jnp.float32)
    running_mean = jnp.zeros((cout,), jnp.float32)
    running_var = jnp.ones((cout,), jnp.float32)
    scale = gamma / jnp.sqrt(running_var + BN_EPS)
    wf = (w * scale).astype(jnp.bfloat16)                 # BN folded into bf16 weights
    b = (beta - running_mean * scale).reshape(1, cout)    # bias stays f32
    if tap:   # 3x3 stride-1: tap-major layout (9, cin, cout); matches im2col K ordering
        return {'kind': 'tap', 'w': wf.reshape(kh * kw, cin, cout), 'b': b}
    return {'kind': 'mat', 'kh': kh, 'kw': kw,
            'w': wf.reshape(kh * kw * cin, cout), 'b': b}


def make_resnet152_params(key, num_classes):
    keys = iter(jax.random.split(key, 1024))
    params = {'conv1': _make_conv_bn(next(keys), 7, 7, 3, 64)}
    inplanes = 64
    stages = []
    for blocks, planes, stride in zip(LAYERS, PLANES, STRIDES):
        stage = []
        for bidx in range(blocks):
            s = stride if bidx == 0 else 1
            blk = {
                'stride': s,
                'conv1': _make_conv_bn(next(keys), 1, 1, inplanes, planes),
                'conv2': _make_conv_bn(next(keys), 3, 3, planes, planes, tap=(s == 1)),
                'conv3': _make_conv_bn(next(keys), 1, 1, planes, planes * EXPANSION),
            }
            if s != 1 or inplanes != planes * EXPANSION:
                blk['down'] = _make_conv_bn(next(keys), 1, 1, inplanes, planes * EXPANSION)
            stage.append(blk)
            inplanes = planes * EXPANSION
        stages.append(stage)
    params['layers'] = stages
    kfw, kfb = jax.random.split(next(keys))
    bound = 1.0 / math.sqrt(512 * EXPANSION)
    params['fc_w'] = jax.random.uniform(kfw, (512 * EXPANSION, num_classes),
                                        jnp.float32, -bound, bound).astype(jnp.bfloat16)
    params['fc_b'] = jax.random.uniform(kfb, (1, num_classes),
                                        jnp.float32, -bound, bound)
    return params


# ----------------------------------------------------------------------------
# Forward pass
# ----------------------------------------------------------------------------
def bottleneck_forward(x, blk):
    s = blk['stride']
    out = conv_bn(x, blk['conv1'], stride=1, relu=True)
    out = conv_bn(out, blk['conv2'], stride=s, relu=True)
    identity = x
    if 'down' in blk:
        identity = conv_bn(x, blk['down'], stride=s, relu=False)
    # conv3 + bn3 + residual add + ReLU fused in one Pallas matmul epilogue
    out = conv_bn(out, blk['conv3'], stride=1, relu=True, residual=identity)
    return out


def resnet_forward(params, x_nchw):
    # NCHW -> NHWC, bf16 activations throughout (f32 epilogues inside kernels)
    x = jnp.transpose(x_nchw, (0, 2, 3, 1)).astype(jnp.bfloat16)
    x = conv_bn(x, params['conv1'], stride=2, relu=True)          # 7x7 s2
    x = _maxpool_3x3_s2(x)
    for stage in params['layers']:
        for blk in stage:
            x = bottleneck_forward(x, blk)
    return _head(x, params['fc_w'], params['fc_b'])


if __name__ == "__main__":
    key = jax.random.PRNGKey(0)
    pkey, xkey = jax.random.split(key)
    num_classes = 10
    params = make_resnet152_params(pkey, num_classes)
    # Small but architecture-consistent input (PyTorch NCHW convention).
    x = jax.random.normal(xkey, (2, 3, 64, 64), jnp.float32)
    logits = resnet_forward(params, x)
    logits = jax.block_until_ready(logits)
    assert logits.shape == (2, num_classes)
    assert bool(jnp.all(jnp.isfinite(logits)))
    print("KERNEL_OK")
</pallas_src>

<mosaic_0001>
module attributes {stable_mosaic.version = 11 : i64} {
  func.func @_fused_matmul_kernel(%arg0: i32, %arg1: i32, %arg2: i32, %arg3: memref<256x256xbf16, #tpu.memory_space<vmem>>, %arg4: memref<256x64xbf16, #tpu.memory_space<vmem>>, %arg5: memref<1x64xf32, #tpu.memory_space<vmem>>, %arg6: memref<256x64xbf16, #tpu.memory_space<vmem>>, %arg7: memref<256x64xf32, #tpu.memory_space<vmem>>) attributes {dimension_semantics = [#tpu.dimension_semantics<parallel>, #tpu.dimension_semantics<parallel>, #tpu.dimension_semantics<arbitrary>], iteration_bounds = array<i64: 8, 1, 1>, scalar_prefetch = 0 : i64, scratch_operands = 1 : i64, tpu.core_type = #tpu.core_type<tc>, window_params = [{transform_indices = @transform_0, window_bounds = array<i64: 256, 256>}, {transform_indices = @transform_1, window_bounds = array<i64: 256, 64>}, {transform_indices = @transform_2, window_bounds = array<i64: 1, 64>}, {transform_indices = @transform_3, window_bounds = array<i64: 256, 64>}]} {
    %c0_i32 = arith.constant 0 : i32
    %0 = arith.cmpi eq, %arg2, %c0_i32 : i32
    %1 = arith.extui %0 : i1 to i32
    %c0_i32_0 = arith.constant 0 : i32
    %2 = arith.cmpi ne, %1, %c0_i32_0 : i32
    scf.if %2 {
      %cst_10 = arith.constant 0.000000e+00 : f32
      %12 = vector.broadcast %cst_10 : f32 to vector<256x64xf32>
      %c0_11 = arith.constant 0 : index
      %c0_12 = arith.constant 0 : index
      %13 = vector.load %arg7[%c0_11, %c0_12] : memref<256x64xf32, #tpu.memory_space<vmem>>, vector<256x64xf32>
      tpu.vector_store %arg7[%c0_11, %c0_12], %12 {strides = array<i32>} : memref<256x64xf32, #tpu.memory_space<vmem>>, vector<256x64xf32>,
    } else {
    }
    %c0 = arith.constant 0 : index
    %c0_1 = arith.constant 0 : index
    %3 = vector.load %arg7[%c0, %c0_1] : memref<256x64xf32, #tpu.memory_space<vmem>>, vector<256x64xf32>
    %c0_2 = arith.constant 0 : index
    %c0_3 = arith.constant 0 : index
    %4 = vector.load %arg3[%c0_2, %c0_3] : memref<256x256xbf16, #tpu.memory_space<vmem>>, vector<256x256xbf16>
    %c0_4 = arith.constant 0 : index
    %c0_5 = arith.constant 0 : index
    %5 = vector.load %arg4[%c0_4, %c0_5] : memref<256x64xbf16, #tpu.memory_space<vmem>>, vector<256x64xbf16>
    %cst = arith.constant dense<0.000000e+00> : vector<256x64xf32>
    %6 = tpu.matmul %4, %5, %cst {dimension_numbers = #tpu.dot_dimension_numbers<[1], [0], [0], [1], [0, 0, 1, 1], [], []>} : vector<256x256xbf16>, vector<256x64xbf16>, vector<256x64xf32> -> vector<256x64xf32>
    %7 = arith.addf %3, %6 : vector<256x64xf32>
    %c0_6 = arith.constant 0 : index
    %c0_7 = arith.constant 0 : index
    %8 = vector.load %arg7[%c0_6, %c0_7] : memref<256x64xf32, #tpu.memory_space<vmem>>, vector<256x64xf32>
    tpu.vector_store %arg7[%c0_6, %c0_7], %7 {strides = array<i32>} : memref<256x64xf32, #tpu.memory_space<vmem>>, vector<256x64xf32>,
    %c0_i32_8 = arith.constant 0 : i32
    %9 = arith.cmpi eq, %arg2, %c0_i32_8 : i32
    %10 = arith.extui %9 : i1 to i32
    %c0_i32_9 = arith.constant 0 : i32
    %11 = arith.cmpi ne, %10, %c0_i32_9 : i32
    scf.if %11 {
      %c0_10 = arith.constant 0 : index
      %c0_11 = arith.constant 0 : index
      %12 = vector.load %arg7[%c0_10, %c0_11] : memref<256x64xf32, #tpu.memory_space<vmem>>, vector<256x64xf32>
      %c0_12 = arith.constant 0 : index
      %c0_13 = arith.constant 0 : index
      %13 = vector.load %arg5[%c0_12, %c0_13] : memref<1x64xf32, #tpu.memory_space<vmem>>, vector<1x64xf32>
      %14 = vector.broadcast %13 : vector<1x64xf32> to vector<256x64xf32>
      %15 = arith.addf %12, %14 : vector<256x64xf32>
      %cst_14 = arith.constant 0.000000e+00 : f32
      %16 = vector.broadcast %cst_14 : f32 to vector<256x64xf32>
      %17 = arith.maximumf %15, %16 : vector<256x64xf32>
      %18 = arith.truncf %17 : vector<256x64xf32> to vector<256x64xbf16>
      %c0_15 = arith.constant 0 : index
      %c0_16 = arith.constant 0 : index
      %19 = vector.load %arg6[%c0_15, %c0_16] : memref<256x64xbf16, #tpu.memory_space<vmem>>, vector<256x64xbf16>
      tpu.vector_store %arg6[%c0_15, %c0_16], %18 {strides = array<i32>} : memref<256x64xbf16, #tpu.memory_space<vmem>>, vector<256x64xbf16>,
    } else {
    }
    return
  }
  func.func @transform_0(%arg0: i32, %arg1: i32, %arg2: i32) -> (i32, i32) {
    %c0_i32 = arith.constant 0 : i32
    return %arg0, %arg2 : i32, i32
  }
  func.func @transform_1(%arg0: i32, %arg1: i32, %arg2: i32) -> (i32, i32) {
    %c0_i32 = arith.constant 0 : i32
    return %arg2, %arg1 : i32, i32
  }
  func.func @transform_2(%arg0: i32, %arg1: i32, %arg2: i32) -> (i32, i32) {
    %c0_i32 = arith.constant 0 : i32
    %c0_i32_0 = arith.constant 0 : i32
    return %c0_i32, %arg1 : i32, i32
  }
  func.func @transform_3(%arg0: i32, %arg1: i32, %arg2: i32) -> (i32, i32) {
    %c0_i32 = arith.constant 0 : i32
    return %arg0, %arg1 : i32, i32
  }
}

</mosaic_0001>

<bundles_post_ra>
// kernel: _conv_mat.1
= control target key start
LH: loop header
LB: loop body
LE: loop exit
PB: predicated region body
PF: predicated region fallthrough
CT: control target
= control target key end

     0   :  { %8 = vsyncpa [#allocation4], 0  ;;  %s2124_s0 = inlined_call_operand.vmem [shape: bf16[2048,256], index: 0, kind: input, shape index: {}]   ;;  %s2125_s1 = inlined_call_operand.vmem [shape: bf16[256,64], index: 1, kind: input, shape index: {}]   ;;  %s2126_s2 = inlined_call_operand.vmem [shape: f32[1,64], index: 2, kind: input, shape index: {}]   ;;  %s2127_s3 = inlined_call_operand.hbm [shape: bf16[2048,64], index: 3, kind: output, shape index: {}]  }
   0x1   :  { %10 = vsyncpa [#allocation4 + $0x1], 0  ;;  %s1753_s12 = smov 0   ;;  %s1755_s13 = smov 0  }
   0x2   :  { %s1757_s14 = smov 0   ;;  %s1759_s15 = smov 0  }
   0x3   :  { %s1761_s16 = smov 0   ;;  %s1763_s17 = smov 0  }
   0x4 LB: > { %s1268_s18 = sadd.s32 4294967295, %s1727_s17   ;;  %s1269_s19 = sadd.s32 4294967294, %s1727_s17   ;;  %s1727_s17 = sphi %s1763_s17, %s16_s17   ;;  %s1723_s16 = sphi %s1761_s16, %s2134_s16   ;;  %s1719_s15 = sphi %s1759_s15, %s2133_s15   ;;  %s1715_s14 = sphi %s1757_s14, %s2132_s14   ;;  %s1711_s13 = sphi %s1755_s13, %s2131_s13   ;;  %s1707_s12 = sphi %s1753_s12, %s2130_s12  }
   0x5   : > { %s35_s20 = sadd.s32 1, %s1723_s16  ;;  %s126_s21 = sadd.s32 1, %s1715_s14 }
   0x6   : > { %p37_p0 = scmp.ge.s32.totalorder %s35_s20, 8  ;;  %p136_p1 = scmp.ne.s32.totalorder %s1715_s14, %s1711_s13 }
   0x7   : > { %p137_p2 = scmp.eq.s32.totalorder %s1268_s18, 7  ;;  %p142_p3 = scmp.ne.s32.totalorder %s1711_s13, %s1707_s12 }
   0x8   : > { %s2136_s20 = smov (%p37_p0, %s35_s20), 0  ;;  %p143_p5 = scmp.eq.s32.totalorder %s1269_s19, 7 }
   0x9   : > { %p1793_p4 = por %p137_p2, %p136_p1  ;;  %s121_s23 = ssub.s32 %s1723_s16, %s2136_s20 }
   0xa   : > { %p1274_p6 = scmp.ge.s32.totalorder %s1727_s17, 1  ;;  %p124_p7 = scmp.eq.s32.totalorder %s121_s23, 0 }
   0xb   : > { %p1800_p8 = por %p143_p5, %p142_p3  ;;  %p194_p9 = scmp.lt.s32.totalorder %s1727_s17, 9 }
   0xc   : > { %s1806_s25 = scalar_select %p124_p7, %s1715_s14, %s126_s21  }
   0xd   : > { %p195_p10 = pnand %p1274_p6, %p194_p9 }
   0xe   : > { %v1585_v0 = vld [vmem:[%s2125_s1 + $0x40] sm:$0xff] (!%p195_p10)   ;;  %s1276_s28 = sshll.u32 (!%p195_p10), %s1719_s15, 5  ;;  %v1587_v2 = vld [vmem:[%s2125_s1 + $0x48] sm:$0xff] (!%p195_p10)   ;;  %v1589_v4 = vld [vmem:[%s2125_s1 + $0x50] sm:$0xff] (!%p195_p10)   ;;  %vm264_vm0 = vcmask (!%p195_p10), 523264   ;;  %v1729_v48 = vmov (!%p195_p10), 0.0  }
   0xf   : > { %198 = sbr.rel (%p195_p10) target bundleno = 354 (0x162), region = 32  ;;  %v1586_v1 = vld [vmem:[%s2125_s1] sm:$0xff] (!%p195_p10)   ;;  %1399 = vmatprep.subr.bf16.mxu0 (!%p195_p10), %v1585_v0  ;;  %1511 = vmatprep.subr.bf16.mxu1 (!%p195_p10), %v1585_v0  ;;  %v1588_v3 = vld [vmem:[%s2125_s1 + $0x8] sm:$0xff] (!%p195_p10)   ;;  %p236_p11 = scmp.lt.s32.totalorder (!%p195_p10), %s1276_s28, 255  ;;  %v1590_v5 = vld [vmem:[%s2125_s1 + $0x10] sm:$0xff] (!%p195_p10)   ;;  %265 = vst.msk [vmem:[#allocation2] sm:$0xff] (!%p195_p10), %vm264_vm0, %v1729_v48 }
  0x10   : > { %1400 = vmatpush3.bf16.msra.mxu0 (!%p195_p10), %v1586_v1  ;;  %1519 = vmatpush3.bf16.msra.mxu1 (!%p195_p10), %v1586_v1  ;;  %v1591_v6 = vld [vmem:[%s2125_s1 + $0x58] sm:$0xff] (!%p195_p10)   ;;  %v1593_v8 = vld [vmem:[%s2125_s1 + $0x60] sm:$0xff] (!%p195_p10)   ;;  %v1595_v10 = vld [vmem:[%s2125_s1 + $0x68] sm:$0xff] (!%p195_p10)   ;;  %266 = vst.msk [vmem:[#allocation2 + $0x8] sm:$0xff] (!%p195_p10), %vm264_vm0, %v1729_v48  ;;  %s231_s30 = sand.u32 (!%p195_p10), 1, %s1711_s13   ;;  %vm1109_vm1 = vcmask (!%p195_p10), 519168  }
  0x11   : > { %1401 = vmatprep.subr.bf16.mxu0 (!%p195_p10), %v1587_v2  ;;  %1512 = vmatprep.subr.bf16.mxu1 (!%p195_p10), %v1587_v2  ;;  %v1592_v7 = vld [vmem:[%s2125_s1 + $0x18] sm:$0xff] (!%p195_p10)   ;;  %v1594_v9 = vld [vmem:[%s2125_s1 + $0x20] sm:$0xff] (!%p195_p10)   ;;  %v1596_v13 = vld [vmem:[%s2125_s1 + $0x28] sm:$0xff] (!%p195_p10)   ;;  %267 = vst.msk [vmem:[#allocation2 + $0x10] sm:$0xff] (!%p195_p10), %vm264_vm0, %v1729_v48  ;;  %s1938_s6 = sshll.u32 (!%p195_p10), %s231_s30, 7  ;;  %s1730_s19 = smov (!%p195_p10), [#allocation3]  }
  0x12   : > { %v1597_v14 = vld [vmem:[%s2125_s1 + $0x70] sm:$0xff] (!%p195_p10)   ;;  %v1599_v16 = vld [vmem:[%s2125_s1 + $0x78] sm:$0xff] (!%p195_p10)   ;;  %268 = vst.msk [vmem:[#allocation2 + $0x18] sm:$0xff] (!%p195_p10), %vm264_vm0, %v1729_v48  ;;  %269 = vst.msk [vmem:[#allocation2 + $0x20] sm:$0xff] (!%p195_p10), %vm264_vm0, %v1729_v48  ;;  %s1949_s7 = scalar_lea.vmem (!%p195_p10), [#allocation3], %s1938_s6  ;;  %s1653_s21 = sshll.u32 (!%p195_p10), %s1730_s19, 4  ;;  %s1654_s21 = int_to_ptr.vmem [resolvable:$false] %s1653_s21 }
  0x13   : > { %v1598_v15 = vld [vmem:[%s2125_s1 + $0x30] sm:$0xff] (!%p195_p10)   ;;  %v1600_v17 = vld [vmem:[%s2125_s1 + $0x38] sm:$0xff] (!%p195_p10)   ;;  %270 = vst.msk [vmem:[#allocation2 + $0x28] sm:$0xff] (!%p195_p10), %vm264_vm0, %v1729_v48  ;;  %271 = vst.msk [vmem:[#allocation2 + $0x30] sm:$0xff] (!%p195_p10), %vm264_vm0, %v1729_v48  ;;  %s1157_s8 = sshll.u32 (!%p195_p10), %s1949_s7, 4  ;;  %s1655_s23 = scalar_lea.vmem (!%p195_p10), %s1654_s21, 4096  ;;  %s2066_s8 = int_to_ptr.vmem [resolvable:$true] %s1157_s8 }
  0x14   : > { %1402 = vmatpush3.bf16.msra.mxu0 (!%p195_p10), %v1588_v3  ;;  %1520 = vmatpush3.bf16.msra.mxu1 (!%p195_p10), %v1588_v3  ;;  %272 = vst.msk [vmem:[#allocation2 + $0x38] sm:$0xff] (!%p195_p10), %vm264_vm0, %v1729_v48  ;;  %273 = vst.msk [vmem:[#allocation2 + $0x40] sm:$0xff] (!%p195_p10), %vm264_vm0, %v1729_v48  ;;  %s1649_s18 = scalar_lea.vmem (!%p195_p10), %s2066_s8, 2048  ;;  %p1656_p1 = scmp.lt.s32.totalorder (!%p195_p10), %s2066_s8, %s1654_s21 }
  0x15   : > { %1403 = vmatprep.subr.bf16.mxu0 (!%p195_p10), %v1589_v4  ;;  %1513 = vmatprep.subr.bf16.mxu1 (!%p195_p10), %v1589_v4  ;;  %274 = vst.msk [vmem:[#allocation2 + $0x48] sm:$0xff] (!%p195_p10), %vm264_vm0, %v1729_v48  ;;  %275 = vst.msk [vmem:[#allocation2 + $0x50] sm:$0xff] (!%p195_p10), %vm264_vm0, %v1729_v48  ;;  %p1650_p12 = scmp.ne.s32.totalorder (!%p195_p10), %s2066_s8, %s1649_s18  ;;  %p1657_p2 = scmp.lt.s32.totalorder (!%p195_p10), %s1655_s23, %s1649_s18 }
  0x16   : > { %s2138_s28 = smov (!%p236_p11, %s1276_s28), 255  ;;  %276 = vst.msk [vmem:[#allocation2 + $0x58] sm:$0xff] %vm264_vm0, %v1729_v48  ;;  %277 = vst.msk [vmem:[#allocation2 + $0x60] sm:$0xff] %vm264_vm0, %v1729_v48  ;;  %v297_v51 = vld [vmem:[#allocation2] sm:$0xff] }
  0x17   : > { %s1365_s26 = sshll.u32 %s2138_s28, 3  ;;  %278 = vst.msk [vmem:[#allocation2 + $0x68] sm:$0xff] %vm264_vm0, %v1729_v48  ;;  %279 = vst.msk [vmem:[#allocation2 + $0x70] sm:$0xff] %vm264_vm0, %v1729_v48  ;;  %v298_v59 = vld [vmem:[#allocation2 + $0x8] sm:$0xff]  ;;  %s1398_s28 = sshll.u32 %s1719_s15, 11 }
  0x18   : > { %1404 = vmatpush3.bf16.msra.mxu0 %v1590_v5  ;;  %1521 = vmatpush3.bf16.msra.mxu1 %v1590_v5  ;;  %s1839_s5 = scalar_lea.vmem %s2124_s0, %s1365_s26  ;;  %280 = vst.msk [vmem:[#allocation2 + $0x78] sm:$0xff] %vm264_vm0, %v1729_v48  ;;  %281 = vst.msk [vmem:[#allocation2 + $0x80] sm:$0xff] %vm264_vm0, %v1729_v48  ;;  %s2064_s11 = scalar_lea.hbm %s2127_s3, %s1398_s28 }
  0x19   : > { %1405 = vmatprep.subr.bf16.mxu0 %v1591_v6  ;;  %1514 = vmatprep.subr.bf16.mxu1 %v1591_v6  ;;  %v1603_v11 = vld [vmem:[%s1839_s5 + $0x4] ss:$8 sps:$4 sm:$0xff]   ;;  %v1601_v18 = vld [vmem:[%s1839_s5] ss:$8 sps:$4 sm:$0xff]   ;;  %v1607_v20 = vld [vmem:[%s1839_s5 + $0x14] ss:$8 sps:$4 sm:$0xff]   ;;  %p1651_p13 = pnand %p1650_p12, %p1793_p4  ;;  %p1658_p3 = por %p1657_p2, %p1656_p1 }
  0x1a   : > { %v1606_v12 = vld [vmem:[%s1839_s5 + $0x84] ss:$8 sps:$4 sm:$0xff]   ;;  %681 = vmatprep.mubr.bf16.mxu0 %v1603_v11  ;;  %v1604_v19 = vld [vmem:[%s1839_s5 + $0x80] ss:$8 sps:$4 sm:$0xff]   ;;  %v1609_v21 = vld [vmem:[%s1839_s5 + $0x94] ss:$8 sps:$4 sm:$0xff]  }
  0x1b   : > { %745 = vmatprep.mubr.bf16.mxu1 %v1606_v12  ;;  %v1611_v22 = vld [vmem:[%s1839_s5 + $0x10] ss:$8 sps:$4 sm:$0xff]   ;;  %v1613_v24 = vld [vmem:[%s1839_s5 + $0x24] ss:$8 sps:$4 sm:$0xff]   ;;  %v1617_v26 = vld [vmem:[%s1839_s5 + $0x20] ss:$8 sps:$4 sm:$0xff]   ;;  %p1652_p0 = pneg %p1651_p13 }
  0x1c   : > { %1406 = vmatpush3.bf16.msra.mxu0 %v1592_v7  ;;  %1522 = vmatpush3.bf16.msra.mxu1 %v1592_v7  ;;  %v1612_v23 = vld [vmem:[%s1839_s5 + $0x90] ss:$8 sps:$4 sm:$0xff]   ;;  %v1615_v25 = vld [vmem:[%s1839_s5 + $0xa4] ss:$8 sps:$4 sm:$0xff]   ;;  %v1618_v27 = vld [vmem:[%s1839_s5 + $0xa0] ss:$8 sps:$4 sm:$0xff]  }
  0x1d   : > { %1407 = vmatprep.subr.bf16.mxu0 %v1593_v8  ;;  %1515 = vmatprep.subr.bf16.mxu1 %v1593_v8  ;;  %v1619_v28 = vld [vmem:[%s1839_s5 + $0x34] ss:$8 sps:$4 sm:$0xff]   ;;  %v1623_v30 = vld [vmem:[%s1839_s5 + $0x30] ss:$8 sps:$4 sm:$0xff]   ;;  %v1625_v32 = vld [vmem:[%s1839_s5 + $0x44] ss:$8 sps:$4 sm:$0xff]   ;;  %p1659_p5 = pnand %p1658_p3, %p1652_p0 }
  0x1e   : > { %v1621_v29 = vld [vmem:[%s1839_s5 + $0xb4] ss:$8 sps:$4 sm:$0xff]   ;;  %v1624_v31 = vld [vmem:[%s1839_s5 + $0xb0] ss:$8 sps:$4 sm:$0xff]   ;;  %v1627_v33 = vld [vmem:[%s1839_s5 + $0xc4] ss:$8 sps:$4 sm:$0xff]  }
  0x1f   : > { %v1629_v34 = vld [vmem:[%s1839_s5 + $0x40] ss:$8 sps:$4 sm:$0xff]   ;;  %v1631_v36 = vld [vmem:[%s1839_s5 + $0x54] ss:$8 sps:$4 sm:$0xff]   ;;  %v1635_v38 = vld [vmem:[%s1839_s5 + $0x50] ss:$8 sps:$4 sm:$0xff]  }
  0x20   : > { %1408 = vmatpush3.bf16.msra.mxu0 %v1594_v9  ;;  %1523 = vmatpush3.bf16.msra.mxu1 %v1594_v9  ;;  %v1630_v35 = vld [vmem:[%s1839_s5 + $0xc0] ss:$8 sps:$4 sm:$0xff]   ;;  %v1633_v37 = vld [vmem:[%s1839_s5 + $0xd4] ss:$8 sps:$4 sm:$0xff]   ;;  %v1636_v39 = vld [vmem:[%s1839_s5 + $0xd0] ss:$8 sps:$4 sm:$0xff]  }
  0x21   : > { %1409 = vmatprep.subr.bf16.mxu0 %v1595_v10  ;;  %1516 = vmatprep.subr.bf16.mxu1 %v1595_v10  ;;  %v1637_v40 = vld [vmem:[%s1839_s5 + $0x64] ss:$8 sps:$4 sm:$0xff]   ;;  %v1641_v42 = vld [vmem:[%s1839_s5 + $0x60] ss:$8 sps:$4 sm:$0xff]   ;;  %v1643_v44 = vld [vmem:[%s1839_s5 + $0x74] ss:$8 sps:$4 sm:$0xff]  }
  0x22   : > { %v1639_v41 = vld [vmem:[%s1839_s5 + $0xe4] ss:$8 sps:$4 sm:$0xff]   ;;  %v1642_v43 = vld [vmem:[%s1839_s5 + $0xe0] ss:$8 sps:$4 sm:$0xff]   ;;  %v1645_v45 = vld [vmem:[%s1839_s5 + $0xf4] ss:$8 sps:$4 sm:$0xff]  }
  0x23   : > { %v1647_v46 = vld [vmem:[%s1839_s5 + $0x70] ss:$8 sps:$4 sm:$0xff]   ;;  %282 = vst.msk [vmem:[#allocation2 + $0x88] sm:$0xff] %vm264_vm0, %v1729_v48  ;;  %283 = vst.msk [vmem:[#allocation2 + $0x90] sm:$0xff] %vm264_vm0, %v1729_v48  ;;  %v313_v53 = vld [vmem:[#allocation2 + $0x80] sm:$0xff]  ;;  %s2078_s15 = scalar_lea.sflag [#allocation4], %s231_s30 }
  0x24   : > { %1410 = vmatpush3.bf16.msra.mxu0 %v1596_v13  ;;  %1524 = vmatpush3.bf16.msra.mxu1 %v1596_v13  ;;  %v1648_v47 = vld [vmem:[%s1839_s5 + $0xf0] ss:$8 sps:$4 sm:$0xff]   ;;  %284 = vst.msk [vmem:[#allocation2 + $0x98] sm:$0xff] %vm264_vm0, %v1729_v48  ;;  %285 = vst.msk [vmem:[#allocation2 + $0xa0] sm:$0xff] %vm264_vm0, %v1729_v48 }
  0x25   : > { %1411 = vmatprep.subr.bf16.mxu0 %v1597_v14  ;;  %1517 = vmatprep.subr.bf16.mxu1 %v1597_v14  ;;  %286 = vst.msk [vmem:[#allocation2 + $0xa8] sm:$0xff] %vm264_vm0, %v1729_v48  ;;  %287 = vst.msk [vmem:[#allocation2 + $0xb0] sm:$0xff] %vm264_vm0, %v1729_v48  ;;  %v299_v7 = vld [vmem:[#allocation2 + $0x10] sm:$0xff] }
  0x26   : > { %288 = vst.msk [vmem:[#allocation2 + $0xb8] sm:$0xff] %vm264_vm0, %v1729_v48  ;;  %289 = vst.msk [vmem:[#allocation2 + $0xc0] sm:$0xff] %vm264_vm0, %v1729_v48 }
  0x27   : > { %290 = vst.msk [vmem:[#allocation2 + $0xc8] sm:$0xff] %vm264_vm0, %v1729_v48  ;;  %291 = vst.msk [vmem:[#allocation2 + $0xd0] sm:$0xff] %vm264_vm0, %v1729_v48 }
  0x28   : > { %1412 = vmatpush3.bf16.msra.mxu0 %v1598_v15  ;;  %1525 = vmatpush3.bf16.msra.mxu1 %v1598_v15  ;;  %292 = vst.msk [vmem:[#allocation2 + $0xd8] sm:$0xff] %vm264_vm0, %v1729_v48  ;;  %293 = vst.msk [vmem:[#allocation2 + $0xe0] sm:$0xff] %vm264_vm0, %v1729_v48  ;;  %v1934_v15 = vld [vmem:[%s2126_s2] ss:$0 sm:$0xff] }
  0x29   : > { %1413 = vmatprep.subr.bf16.mxu0 %v1599_v16  ;;  %1518 = vmatprep.subr.bf16.mxu1 %v1599_v16  ;;  %294 = vst.msk [vmem:[#allocation2 + $0xe8] sm:$0xff] %vm264_vm0, %v1729_v48  ;;  %295 = vst.msk [vmem:[#allocation2 + $0xf0] sm:$0xff] %vm264_vm0, %v1729_v48  ;;  %v300_v16 = vld [vmem:[#allocation2 + $0x18] sm:$0xff] }
  0x2a   : > { %296 = vst.msk [vmem:[#allocation2 + $0xf8] sm:$0xff] %vm264_vm0, %v1729_v48  ;;  %v314_v61 = vld [vmem:[#allocation2 + $0x88] sm:$0xff]  ;;  %v315_v9 = vld [vmem:[#allocation2 + $0x90] sm:$0xff] }
  0x2c   : > { %1414 = vmatpush3.bf16.msra.mxu0 %v1600_v17  ;;  %1526 = vmatpush3.bf16.msra.mxu1 %v1600_v17 }
  0x2f   : > { %682 = vmatmul.mubr.bf16.vlgmr.msra.gmra.mrb[0].mxu0 %v1601_v18  ;;  %746 = vmatmul.mubr.bf16.vlgmr.msra.gmra.mrb[0].mxu1 %v1604_v19  ;;  %v316_v18 = vld [vmem:[#allocation2 + $0x98] sm:$0xff] }
  0x30   : > { %689 = vmatprep.mubr.bf16.mxu0 %v1607_v20  ;;  %753 = vmatprep.mubr.bf16.mxu1 %v1609_v21 }
  0x37   : > { %690 = vmatmul.mubr.bf16.gmra.mrb[4].mxu0 %v1611_v22  ;;  %754 = vmatmul.mubr.bf16.gmra.mrb[4].mxu1 %v1612_v23 }
  0x38   : > { %697 = vmatprep.mubr.bf16.mxu0 %v1613_v24  ;;  %761 = vmatprep.mubr.bf16.mxu1 %v1615_v25 }
  0x3f   : > { %698 = vmatmul.mubr.bf16.gmra.mrb[8].mxu0 %v1617_v26  ;;  %762 = vmatmul.mubr.bf16.gmra.mrb[8].mxu1 %v1618_v27 }
  0x40   : > { %705 = vmatprep.mubr.bf16.mxu0 %v1619_v28  ;;  %769 = vmatprep.mubr.bf16.mxu1 %v1621_v29 }
  0x47   : > { %706 = vmatmul.mubr.bf16.gmra.mrb[12].mxu0 %v1623_v30  ;;  %770 = vmatmul.mubr.bf16.gmra.mrb[12].mxu1 %v1624_v31 }
  0x48   : > { %713 = vmatprep.mubr.bf16.mxu0 %v1625_v32  ;;  %777 = vmatprep.mubr.bf16.mxu1 %v1627_v33 }
  0x4f   : > { %714 = vmatmul.mubr.bf16.gmra.mrb[16].mxu0 %v1629_v34  ;;  %778 = vmatmul.mubr.bf16.gmra.mrb[16].mxu1 %v1630_v35 }
  0x50   : > { %721 = vmatprep.mubr.bf16.mxu0 %v1631_v36  ;;  %785 = vmatprep.mubr.bf16.mxu1 %v1633_v37 }
  0x57   : > { %722 = vmatmul.mubr.bf16.gmra.mrb[20].mxu0 %v1635_v38  ;;  %786 = vmatmul.mubr.bf16.gmra.mrb[20].mxu1 %v1636_v39 }
  0x58   : > { %729 = vmatprep.mubr.bf16.mxu0 %v1637_v40  ;;  %793 = vmatprep.mubr.bf16.mxu1 %v1639_v41 }
  0x5f   : > { %730 = vmatmul.mubr.bf16.gmra.mrb[24].mxu0 %v1641_v42  ;;  %794 = vmatmul.mubr.bf16.gmra.mrb[24].mxu1 %v1642_v43 }
  0x60   : > { %737 = vmatprep.mubr.bf16.mxu0 %v1643_v44  ;;  %801 = vmatprep.mubr.bf16.mxu1 %v1645_v45  ;;  %v301_v44 = vld [vmem:[#allocation2 + $0x20] sm:$0xff] }
  0x61   : > { %v317_v45 = vld [vmem:[#allocation2 + $0xa0] sm:$0xff] }
  0x67   : > { %738 = vmatmul.mubr.bf16.gmra.mrb[28].mxu0 %v1647_v46  ;;  %802 = vmatmul.mubr.bf16.gmra.mrb[28].mxu1 %v1648_v47 }
 0x102   : > { %v1415_v49 = vpop.f32.mrb[0].mxu0  ;;  %v1463_v50 = vpop.f32.mrb[0].mxu1 }
 0x103   : > { %v1416_v52 = vpop.f32.mrb[1].mxu0  ;;  %v1464_v54 = vpop.f32.mrb[1].mxu1 }
 0x104   : > { %v1417_v55 = vadd.f32 %v1416_v52, %v1415_v49  ;;  %v1465_v56 = vadd.f32 %v1464_v54, %v1463_v50  ;;  %v1418_v57 = vpop.f32.mrb[2].mxu0  ;;  %v1466_v58 = vpop.f32.mrb[2].mxu1  ;;  %v302_v50 = vld [vmem:[#allocation2 + $0x28] sm:$0xff] }
 0x105   : > { %v1419_v60 = vpop.f32.mrb[3].mxu0  ;;  %v1467_v62 = vpop.f32.mrb[3].mxu1  ;;  %v318_v52 = vld [vmem:[#allocation2 + $0xa8] sm:$0xff] }
 0x106   : > { %v810_v63 = vadd.f32 %v1417_v55, %v297_v51  ;;  %v826_v0 = vadd.f32 %v1465_v56, %v313_v53  ;;  %v1420_v1 = vadd.f32 %v1419_v60, %v1418_v57  ;;  %v1468_v2 = vadd.f32 %v1467_v62, %v1466_v58 }
 0x108   : > { %843 = vst.msk [vmem:[#allocation2] sm:$0xff] %vm264_vm0, %v810_v63  ;;  %859 = vst.msk [vmem:[#allocation2 + $0x80] sm:$0xff] %vm264_vm0, %v826_v0  ;;  %v811_v3 = vadd.f32 %v1420_v1, %v298_v59  ;;  %v827_v4 = vadd.f32 %v1468_v2, %v314_v61 }
 0x10a   : > { %844 = vst.msk [vmem:[#allocation2 + $0x8] sm:$0xff] %vm264_vm0, %v811_v3  ;;  %860 = vst.msk [vmem:[#allocation2 + $0x88] sm:$0xff] %vm264_vm0, %v827_v4  ;;  %v1421_v5 = vpop.f32.mrb[4].mxu0  ;;  %v1469_v6 = vpop.f32.mrb[4].mxu1 }
 0x10b   : > { %v1422_v8 = vpop.f32.mrb[5].mxu0  ;;  %v1470_v10 = vpop.f32.mrb[5].mxu1 }
 0x10c   : > { %v1423_v11 = vadd.f32 %v1422_v8, %v1421_v5  ;;  %v1471_v12 = vadd.f32 %v1470_v10, %v1469_v6  ;;  %v1424_v13 = vpop.f32.mrb[6].mxu0  ;;  %v1472_v14 = vpop.f32.mrb[6].mxu1 }
 0x10d   : > { %v1425_v17 = vpop.f32.mrb[7].mxu0  ;;  %v1473_v19 = vpop.f32.mrb[7].mxu1 }
 0x10e   : > { %v812_v20 = vadd.f32 %v1423_v11, %v299_v7  ;;  %v828_v21 = vadd.f32 %v1471_v12, %v315_v9  ;;  %v1426_v22 = vadd.f32 %v1425_v17, %v1424_v13  ;;  %v1474_v23 = vadd.f32 %v1473_v19, %v1472_v14  ;;  %v303_v17 = vld [vmem:[#allocation2 + $0x30] sm:$0xff] }
 0x10f   : > { %v878_v24 = vld [vmem:[#allocation2] sm:$0xff] }
 0x110   : > { %v894_v25 = vld [vmem:[#allocation2 + $0x80] sm:$0xff]  ;;  %v917_v26 = vadd.f32 %v1934_v15, %v878_v24  ;;  %845 = vst.msk [vmem:[#allocation2 + $0x10] sm:$0xff] %vm264_vm0, %v812_v20  ;;  %861 = vst.msk [vmem:[#allocation2 + $0x90] sm:$0xff] %vm264_vm0, %v828_v21  ;;  %v813_v28 = vadd.f32 %v1426_v22, %v300_v16  ;;  %v829_v29 = vadd.f32 %v1474_v23, %v316_v18  ;;  %v319_v18 = vld [vmem:[#allocation2 + $0xb0] sm:$0xff] }
 0x111   : > { %v933_v27 = vadd.f32 %v1934_v15, %v894_v25  ;;  %v879_v30 = vld [vmem:[#allocation2 + $0x8] sm:$0xff]  ;;  %v304_v23 = vld [vmem:[#allocation2 + $0x38] sm:$0xff] }
 0x112   : > { %v895_v31 = vld [vmem:[#allocation2 + $0x88] sm:$0xff]  ;;  %v949_v32 = vmax.f32 %v917_v26, 0.0  ;;  %v918_v34 = vadd.f32 %v1934_v15, %v879_v30  ;;  %846 = vst.msk [vmem:[#allocation2 + $0x18] sm:$0xff] %vm264_vm0, %v813_v28  ;;  %862 = vst.msk [vmem:[#allocation2 + $0x98] sm:$0xff] %vm264_vm0, %v829_v29  ;;  %v1427_v36 = vpop.f32.mrb[8].mxu0  ;;  %v1475_v37 = vpop.f32.mrb[8].mxu1 }
 0x113   : > { %v965_v33 = vmax.f32 %v933_v27, 0.0  ;;  %v934_v35 = vadd.f32 %v1934_v15, %v895_v31  ;;  %v1428_v38 = vpop.f32.mrb[9].mxu0  ;;  %v1476_v39 = vpop.f32.mrb[9].mxu1  ;;  %v320_v25 = vld [vmem:[#allocation2 + $0xb8] sm:$0xff] }
 0x114   : > { %v1366_v40 = vpack.c.bf16 %v949_v32, %v949_v32  ;;  %v950_v42 = vmax.f32 %v918_v34, 0.0  ;;  %v1430_v46 = vpop.f32.mrb[10].mxu0  ;;  %v1478_v47 = vpop.f32.mrb[10].mxu1  ;;  %v1429_v48 = vadd.f32 %v1428_v38, %v1427_v36  ;;  %v1477_v49 = vadd.f32 %v1476_v39, %v1475_v37 }
 0x115   : > { %v1382_v41 = vpack.c.bf16 %v965_v33, %v965_v33  ;;  %v966_v43 = vmax.f32 %v934_v35, 0.0  ;;  %v1431_v51 = vpop.f32.mrb[11].mxu0  ;;  %v1479_v53 = vpop.f32.mrb[11].mxu1 }
 0x116   : > { %1110 = vst.msk [vmem:[%s1949_s7] sm:$0xf] %vm1109_vm1, %v1366_v40  ;;  %v1367_v54 = vpack.c.bf16 %v950_v42, %v950_v42  ;;  %v1432_v56 = vadd.f32 %v1431_v51, %v1430_v46  ;;  %v1480_v57 = vadd.f32 %v1479_v53, %v1478_v47  ;;  %v814_v60 = vadd.f32 %v1429_v48, %v301_v44  ;;  %v305_v47 = vld [vmem:[#allocation2 + $0x40] sm:$0xff] }
 0x117   : > { %1126 = vst.msk [vmem:[%s1949_s7 + $0x40] sm:$0xf] %vm1109_vm1, %v1382_v41  ;;  %v1383_v55 = vpack.c.bf16 %v966_v43, %v966_v43  ;;  %v880_v58 = vld [vmem:[#allocation2 + $0x10] sm:$0xff]  ;;  %v830_v61 = vadd.f32 %v1477_v49, %v317_v45  ;;  %v321_v49 = vld [vmem:[#allocation2 + $0xc0] sm:$0xff] }
 0x118   : > { %v896_v59 = vld [vmem:[#allocation2 + $0x90] sm:$0xff]  ;;  %1111 = vst.msk [vmem:[%s1949_s7 + $0x4] sm:$0xf] %vm1109_vm1, %v1367_v54  ;;  %v919_v62 = vadd.f32 %v1934_v15, %v880_v58  ;;  %v815_v0 = vadd.f32 %v1432_v56, %v302_v50  ;;  %v831_v1 = vadd.f32 %v1480_v57, %v318_v52 }
 0x119   : > { %1127 = vst.msk [vmem:[%s1949_s7 + $0x44] sm:$0xf] %vm1109_vm1, %v1383_v55  ;;  %v935_v63 = vadd.f32 %v1934_v15, %v896_v59  ;;  %v881_v2 = vld [vmem:[#allocation2 + $0x18] sm:$0xff] }
 0x11a   : > { %v897_v3 = vld [vmem:[#allocation2 + $0x98] sm:$0xff]  ;;  %847 = vst.msk [vmem:[#allocation2 + $0x20] sm:$0xff] %vm264_vm0, %v814_v60  ;;  %863 = vst.msk [vmem:[#allocation2 + $0xa0] sm:$0xff] %vm264_vm0, %v830_v61  ;;  %v951_v4 = vmax.f32 %v919_v62, 0.0  ;;  %v920_v6 = vadd.f32 %v1934_v15, %v881_v2  ;;  %v1433_v8 = vpop.f32.mrb[12].mxu0  ;;  %v1481_v9 = vpop.f32.mrb[12].mxu1 }
 0x11b   : > { %v967_v5 = vmax.f32 %v935_v63, 0.0  ;;  %v936_v7 = vadd.f32 %v1934_v15, %v897_v3  ;;  %848 = vst.msk [vmem:[#allocation2 + $0x28] sm:$0xff] %vm264_vm0, %v815_v0  ;;  %864 = vst.msk [vmem:[#allocation2 + $0xa8] sm:$0xff] %vm264_vm0, %v831_v1  ;;  %v1434_v10 = vpop.f32.mrb[13].mxu0  ;;  %v1482_v11 = vpop.f32.mrb[13].mxu1  ;;  %v306_v1 = vld [vmem:[#allocation2 + $0x48] sm:$0xff] }
 0x11c   : > { %v1368_v12 = vpack.c.bf16 %v951_v4, %v951_v4  ;;  %v952_v14 = vmax.f32 %v920_v6, 0.0  ;;  %v1436_v19 = vpop.f32.mrb[14].mxu0  ;;  %v1484_v20 = vpop.f32.mrb[14].mxu1  ;;  %v1435_v21 = vadd.f32 %v1434_v10, %v1433_v8  ;;  %v1483_v22 = vadd.f32 %v1482_v11, %v1481_v9  ;;  %v322_v2 = vld [vmem:[#allocation2 + $0xc8] sm:$0xff] }
 0x11d   : > { %v1384_v13 = vpack.c.bf16 %v967_v5, %v967_v5  ;;  %v968_v16 = vmax.f32 %v936_v7, 0.0  ;;  %v1437_v24 = vpop.f32.mrb[15].mxu0  ;;  %v1485_v26 = vpop.f32.mrb[15].mxu1 }
 0x11e   : > { %1112 = vst.msk [vmem:[%s1949_s7 + $0x8] sm:$0xf] %vm1109_vm1, %v1368_v12  ;;  %v1369_v27 = vpack.c.bf16 %v952_v14, %v952_v14  ;;  %v1438_v29 = vadd.f32 %v1437_v24, %v1436_v19  ;;  %v1486_v30 = vadd.f32 %v1485_v26, %v1484_v20  ;;  %v816_v31 = vadd.f32 %v1435_v21, %v303_v17  ;;  %v307_v20 = vld [vmem:[#allocation2 + $0x50] sm:$0xff] }
 0x11f   : > { %1128 = vst.msk [vmem:[%s1949_s7 + $0x48] sm:$0xf] %vm1109_vm1, %v1384_v13  ;;  %v1385_v28 = vpack.c.bf16 %v968_v16, %v968_v16  ;;  %v832_v32 = vadd.f32 %v1483_v22, %v319_v18  ;;  %v323_v22 = vld [vmem:[#allocation2 + $0xd0] sm:$0xff] }
 0x120   : > { %1113 = vst.msk [vmem:[%s1949_s7 + $0xc] sm:$0xf] %vm1109_vm1, %v1369_v27  ;;  %v817_v35 = vadd.f32 %v1438_v29, %v304_v23  ;;  %v833_v36 = vadd.f32 %v1486_v30, %v320_v25 }
 0x121   : > { %1129 = vst.msk [vmem:[%s1949_s7 + $0x4c] sm:$0xf] %vm1109_vm1, %v1385_v28  ;;  %v882_v33 = vld [vmem:[#allocation2 + $0x20] sm:$0xff] }
 0x122   : > { %v898_v34 = vld [vmem:[#allocation2 + $0xa0] sm:$0xff]  ;;  %v921_v37 = vadd.f32 %v1934_v15, %v882_v33  ;;  %v883_v39 = vld [vmem:[#allocation2 + $0x28] sm:$0xff]  ;;  %849 = vst.msk [vmem:[#allocation2 + $0x30] sm:$0xff] %vm264_vm0, %v816_v31  ;;  %865 = vst.msk [vmem:[#allocation2 + $0xb0] sm:$0xff] %vm264_vm0, %v832_v32  ;;  %v1439_v43 = vpop.f32.mrb[16].mxu0  ;;  %v1487_v44 = vpop.f32.mrb[16].mxu1 }
 0x123   : > { %v937_v38 = vadd.f32 %v1934_v15, %v898_v34  ;;  %v899_v40 = vld [vmem:[#allocation2 + $0xa8] sm:$0xff]  ;;  %v922_v41 = vadd.f32 %v1934_v15, %v883_v39  ;;  %850 = vst.msk [vmem:[#allocation2 + $0x38] sm:$0xff] %vm264_vm0, %v817_v35  ;;  %866 = vst.msk [vmem:[#allocation2 + $0xb8] sm:$0xff] %vm264_vm0, %v833_v36  ;;  %v1440_v48 = vpop.f32.mrb[17].mxu0  ;;  %v1488_v50 = vpop.f32.mrb[17].mxu1  ;;  %v324_v39 = vld [vmem:[#allocation2 + $0xd8] sm:$0xff] }
 0x124   : > { %v938_v42 = vadd.f32 %v1934_v15, %v899_v40  ;;  %v953_v45 = vmax.f32 %v921_v37, 0.0  ;;  %v1441_v53 = vadd.f32 %v1440_v48, %v1439_v43  ;;  %v1489_v54 = vadd.f32 %v1488_v50, %v1487_v44  ;;  %v1442_v55 = vpop.f32.mrb[18].mxu0  ;;  %v1490_v56 = vpop.f32.mrb[18].mxu1 }
 0x125   : > { %v969_v46 = vmax.f32 %v937_v38, 0.0  ;;  %v954_v51 = vmax.f32 %v922_v41, 0.0  ;;  %v1443_v59 = vpop.f32.mrb[19].mxu0  ;;  %v1491_v60 = vpop.f32.mrb[19].mxu1  ;;  %v308_v38 = vld [vmem:[#allocation2 + $0x58] sm:$0xff] }
 0x126   : > { %v970_v52 = vmax.f32 %v938_v42, 0.0  ;;  %v1370_v57 = vpack.c.bf16 %v953_v45, %v953_v45  ;;  %v818_v63 = vadd.f32 %v1441_v53, %v305_v47  ;;  %v834_v0 = vadd.f32 %v1489_v54, %v321_v49 }
 0x127   : > { %v1386_v58 = vpack.c.bf16 %v969_v46, %v969_v46  ;;  %v1371_v61 = vpack.c.bf16 %v954_v51, %v954_v51  ;;  %v1444_v3 = vadd.f32 %v1443_v59, %v1442_v55  ;;  %v1492_v4 = vadd.f32 %v1491_v60, %v1490_v56  ;;  %v309_v56 = vld [vmem:[#allocation2 + $0x60] sm:$0xff] }
 0x128   : > { %v1387_v62 = vpack.c.bf16 %v970_v52, %v970_v52  ;;  %1114 = vst.msk [vmem:[%s1949_s7 + $0x10] sm:$0xf] %vm1109_vm1, %v1370_v57 }
 0x129   : > { %1130 = vst.msk [vmem:[%s1949_s7 + $0x50] sm:$0xf] %vm1109_vm1, %v1386_v58  ;;  %1115 = vst.msk [vmem:[%s1949_s7 + $0x14] sm:$0xf] %vm1109_vm1, %v1371_v61  ;;  %v884_v5 = vld [vmem:[#allocation2 + $0x30] sm:$0xff]  ;;  %v819_v11 = vadd.f32 %v1444_v3, %v306_v1  ;;  %v835_v12 = vadd.f32 %v1492_v4, %v322_v2  ;;  %v325_v58 = vld [vmem:[#allocation2 + $0xe0] sm:$0xff] }
 0x12a   : > { %1131 = vst.msk [vmem:[%s1949_s7 + $0x54] sm:$0xf] %vm1109_vm1, %v1387_v62  ;;  %v900_v6 = vld [vmem:[#allocation2 + $0xb0] sm:$0xff]  ;;  %v923_v7 = vadd.f32 %v1934_v15, %v884_v5  ;;  %v885_v9 = vld [vmem:[#allocation2 + $0x38] sm:$0xff]  ;;  %v1445_v16 = vpop.f32.mrb[20].mxu0  ;;  %v1493_v17 = vpop.f32.mrb[20].mxu1 }
 0x12b   : > { %851 = vst.msk [vmem:[#allocation2 + $0x40] sm:$0xff] %vm264_vm0, %v818_v63  ;;  %867 = vst.msk [vmem:[#allocation2 + $0xc0] sm:$0xff] %vm264_vm0, %v834_v0  ;;  %v939_v8 = vadd.f32 %v1934_v15, %v900_v6  ;;  %v901_v10 = vld [vmem:[#allocation2 + $0xb8] sm:$0xff]  ;;  %v924_v13 = vadd.f32 %v1934_v15, %v885_v9  ;;  %v1446_v21 = vpop.f32.mrb[21].mxu0  ;;  %v1494_v23 = vpop.f32.mrb[21].mxu1  ;;  %v310_v4 = vld [vmem:[#allocation2 + $0x68] sm:$0xff] }
 0x12c   : > { %v940_v14 = vadd.f32 %v1934_v15, %v901_v10  ;;  %v955_v18 = vmax.f32 %v923_v7, 0.0  ;;  %852 = vst.msk [vmem:[#allocation2 + $0x48] sm:$0xff] %vm264_vm0, %v819_v11  ;;  %868 = vst.msk [vmem:[#allocation2 + $0xc8] sm:$0xff] %vm264_vm0, %v835_v12  ;;  %v1447_v26 = vadd.f32 %v1446_v21, %v1445_v16  ;;  %v1495_v27 = vadd.f32 %v1494_v23, %v1493_v17  ;;  %v1448_v28 = vpop.f32.mrb[22].mxu0  ;;  %v1496_v29 = vpop.f32.mrb[22].mxu1  ;;  %v326_v6 = vld [vmem:[#allocation2 + $0xe8] sm:$0xff] }
 0x12d   : > { %v971_v19 = vmax.f32 %v939_v8, 0.0  ;;  %v956_v24 = vmax.f32 %v924_v13, 0.0  ;;  %v1449_v32 = vpop.f32.mrb[23].mxu0  ;;  %v1497_v33 = vpop.f32.mrb[23].mxu1 }
 0x12e   : > { %v972_v25 = vmax.f32 %v940_v14, 0.0  ;;  %v1372_v30 = vpack.c.bf16 %v955_v18, %v955_v18  ;;  %v820_v36 = vadd.f32 %v1447_v26, %v307_v20  ;;  %v836_v37 = vadd.f32 %v1495_v27, %v323_v22 }
 0x12f   : > { %v1388_v31 = vpack.c.bf16 %v971_v19, %v971_v19  ;;  %v1373_v34 = vpack.c.bf16 %v956_v24, %v956_v24  ;;  %v1450_v42 = vadd.f32 %v1449_v32, %v1448_v28  ;;  %v1498_v43 = vadd.f32 %v1497_v33, %v1496_v29  ;;  %v311_v29 = vld [vmem:[#allocation2 + $0x70] sm:$0xff] }
 0x130   : > { %v1389_v35 = vpack.c.bf16 %v972_v25, %v972_v25  ;;  %1116 = vst.msk [vmem:[%s1949_s7 + $0x18] sm:$0xf] %vm1109_vm1, %v1372_v30 }
 0x131   : > { %1132 = vst.msk [vmem:[%s1949_s7 + $0x58] sm:$0xf] %vm1109_vm1, %v1388_v31  ;;  %1117 = vst.msk [vmem:[%s1949_s7 + $0x1c] sm:$0xf] %vm1109_vm1, %v1373_v34  ;;  %v821_v46 = vadd.f32 %v1450_v42, %v308_v38  ;;  %v837_v47 = vadd.f32 %v1498_v43, %v324_v39  ;;  %v327_v31 = vld [vmem:[#allocation2 + $0xf0] sm:$0xff]  ;;  %v328_v43 = vld [vmem:[#allocation2 + $0xf8] sm:$0xff] }
 0x132   : > { %v886_v40 = vld [vmem:[#allocation2 + $0x40] sm:$0xff]  ;;  %1133 = vst.msk [vmem:[%s1949_s7 + $0x5c] sm:$0xf] %vm1109_vm1, %v1389_v35  ;;  %v1451_v52 = vpop.f32.mrb[24].mxu0  ;;  %v1499_v53 = vpop.f32.mrb[24].mxu1 }
 0x133   : > { %v902_v41 = vld [vmem:[#allocation2 + $0xc0] sm:$0xff]  ;;  %v925_v44 = vadd.f32 %v1934_v15, %v886_v40  ;;  %853 = vst.msk [vmem:[#allocation2 + $0x50] sm:$0xff] %vm264_vm0, %v820_v36  ;;  %869 = vst.msk [vmem:[#allocation2 + $0xd0] sm:$0xff] %vm264_vm0, %v836_v37  ;;  %v887_v50 = vld [vmem:[#allocation2 + $0x48] sm:$0xff]  ;;  %v1452_v57 = vpop.f32.mrb[25].mxu0  ;;  %v1500_v59 = vpop.f32.mrb[25].mxu1 }
 0x134   : > { %v941_v45 = vadd.f32 %v1934_v15, %v902_v41  ;;  %v903_v51 = vld [vmem:[#allocation2 + $0xc8] sm:$0xff]  ;;  %v926_v54 = vadd.f32 %v1934_v15, %v887_v50  ;;  %854 = vst.msk [vmem:[#allocation2 + $0x58] sm:$0xff] %vm264_vm0, %v821_v46  ;;  %870 = vst.msk [vmem:[#allocation2 + $0xd8] sm:$0xff] %vm264_vm0, %v837_v47  ;;  %v1453_v62 = vadd.f32 %v1452_v57, %v1451_v52  ;;  %v1454_v0 = vpop.f32.mrb[26].mxu0  ;;  %v1502_v1 = vpop.f32.mrb[26].mxu1  ;;  %v312_v41 = vld [vmem:[#allocation2 + $0x78] sm:$0xff] }
 0x135   : > { %v957_v48 = vmax.f32 %v925_v44, 0.0  ;;  %v942_v55 = vadd.f32 %v1934_v15, %v903_v51  ;;  %v1501_v63 = vadd.f32 %v1500_v59, %v1499_v53  ;;  %v1455_v5 = vpop.f32.mrb[27].mxu0  ;;  %v1503_v7 = vpop.f32.mrb[27].mxu1 }
 0x136   : > { %v973_v49 = vmax.f32 %v941_v45, 0.0  ;;  %v958_v2 = vmax.f32 %v926_v54, 0.0  ;;  %v822_v8 = vadd.f32 %v1453_v62, %v309_v56  ;;  %v1456_v10 = vadd.f32 %v1455_v5, %v1454_v0 }
 0x137   : > { %v1374_v60 = vpack.c.bf16 %v957_v48, %v957_v48  ;;  %v974_v3 = vmax.f32 %v942_v55, 0.0  ;;  %v838_v9 = vadd.f32 %v1501_v63, %v325_v58  ;;  %v1504_v11 = vadd.f32 %v1503_v7, %v1502_v1 }
 0x138   : > { %v1390_v61 = vpack.c.bf16 %v973_v49, %v973_v49  ;;  %v1375_v12 = vpack.c.bf16 %v958_v2, %v958_v2  ;;  %855 = vst.msk [vmem:[#allocation2 + $0x60] sm:$0xff] %vm264_vm0, %v822_v8  ;;  %v823_v19 = vadd.f32 %v1456_v10, %v310_v4 }
 0x139   : > { %1118 = vst.msk [vmem:[%s1949_s7 + $0x20] sm:$0xf] %vm1109_vm1, %v1374_v60  ;;  %v1391_v13 = vpack.c.bf16 %v974_v3, %v974_v3  ;;  %v839_v20 = vadd.f32 %v1504_v11, %v326_v6 }
 0x13a   : > { %1134 = vst.msk [vmem:[%s1949_s7 + $0x60] sm:$0xf] %vm1109_vm1, %v1390_v61  ;;  %v888_v14 = vld [vmem:[#allocation2 + $0x50] sm:$0xff]  ;;  %1119 = vst.msk [vmem:[%s1949_s7 + $0x24] sm:$0xf] %vm1109_vm1, %v1375_v12  ;;  %v1457_v25 = vpop.f32.mrb[28].mxu0 }
 0x13b   : > { %v904_v16 = vld [vmem:[#allocation2 + $0xd0] sm:$0xff]  ;;  %v927_v17 = vadd.f32 %v1934_v15, %v888_v14  ;;  %871 = vst.msk [vmem:[#allocation2 + $0xe0] sm:$0xff] %vm264_vm0, %v838_v9  ;;  %v889_v23 = vld [vmem:[#allocation2 + $0x58] sm:$0xff]  ;;  %856 = vst.msk [vmem:[#allocation2 + $0x68] sm:$0xff] %vm264_vm0, %v823_v19  ;;  %v1505_v26 = vpop.f32.mrb[28].mxu1  ;;  %v1458_v30 = vpop.f32.mrb[29].mxu0 }
 0x13c   : > { %v943_v18 = vadd.f32 %v1934_v15, %v904_v16  ;;  %1135 = vst.msk [vmem:[%s1949_s7 + $0x64] sm:$0xf] %vm1109_vm1, %v1391_v13  ;;  %v905_v24 = vld [vmem:[#allocation2 + $0xd8] sm:$0xff]  ;;  %v928_v27 = vadd.f32 %v1934_v15, %v889_v23  ;;  %v1506_v32 = vpop.f32.mrb[29].mxu1  ;;  %v1459_v35 = vadd.f32 %v1458_v30, %v1457_v25  ;;  %v1460_v37 = vpop.f32.mrb[30].mxu0 }
 0x13d   : > { %v959_v21 = vmax.f32 %v927_v17, 0.0  ;;  %872 = vst.msk [vmem:[#allocation2 + $0xe8] sm:$0xff] %vm264_vm0, %v839_v20  ;;  %v944_v28 = vadd.f32 %v1934_v15, %v905_v24  ;;  %v1507_v36 = vadd.f32 %v1506_v32, %v1505_v26  ;;  %v1508_v38 = vpop.f32.mrb[30].mxu1  ;;  %v1461_v42 = vpop.f32.mrb[31].mxu0 }
 0x13e   : > { %v975_v22 = vmax.f32 %v943_v18, 0.0  ;;  %v960_v39 = vmax.f32 %v928_v27, 0.0  ;;  %v1509_v44 = vpop.f32.mrb[31].mxu1  ;;  %v824_v45 = vadd.f32 %v1459_v35, %v311_v29  ;;  %v1462_v47 = vadd.f32 %v1461_v42, %v1460_v37 }
 0x13f   : > { %v1376_v33 = vpack.c.bf16 %v959_v21, %v959_v21  ;;  %v976_v40 = vmax.f32 %v944_v28, 0.0  ;;  %v840_v46 = vadd.f32 %v1507_v36, %v327_v31  ;;  %v1510_v48 = vadd.f32 %v1509_v44, %v1508_v38  ;;  %v890_v51 = vld [vmem:[#allocation2 + $0x60] sm:$0xff] }
 0x140   : > { %v1392_v34 = vpack.c.bf16 %v975_v22, %v975_v22  ;;  %v1377_v49 = vpack.c.bf16 %v960_v39, %v960_v39  ;;  %v929_v53 = vadd.f32 %v1934_v15, %v890_v51  ;;  %857 = vst.msk [vmem:[#allocation2 + $0x70] sm:$0xff] %vm264_vm0, %v824_v45  ;;  %v825_v55 = vadd.f32 %v1462_v47, %v312_v41 }
 0x141   : > { %1120 = vst.msk [vmem:[%s1949_s7 + $0x28] sm:$0xf] %vm1109_vm1, %v1376_v33  ;;  %v1393_v50 = vpack.c.bf16 %v976_v40, %v976_v40  ;;  %v841_v56 = vadd.f32 %v1510_v48, %v328_v43 }
 0x142   : > { %1136 = vst.msk [vmem:[%s1949_s7 + $0x68] sm:$0xf] %vm1109_vm1, %v1392_v34  ;;  %v906_v52 = vld [vmem:[#allocation2 + $0xe0] sm:$0xff]  ;;  %1121 = vst.msk [vmem:[%s1949_s7 + $0x2c] sm:$0xf] %vm1109_vm1, %v1377_v49  ;;  %v891_v57 = vld [vmem:[#allocation2 + $0x68] sm:$0xff] }
 0x143   : > { %v945_v54 = vadd.f32 %v1934_v15, %v906_v52  ;;  %873 = vst.msk [vmem:[#allocation2 + $0xf0] sm:$0xff] %vm264_vm0, %v840_v46  ;;  %v961_v59 = vmax.f32 %v929_v53, 0.0  ;;  %v930_v61 = vadd.f32 %v1934_v15, %v891_v57  ;;  %858 = vst.msk [vmem:[#allocation2 + $0x78] sm:$0xff] %vm264_vm0, %v825_v55 }
 0x144   : > { %1137 = vst.msk [vmem:[%s1949_s7 + $0x6c] sm:$0xf] %vm1109_vm1, %v1393_v50  ;;  %v907_v58 = vld [vmem:[#allocation2 + $0xe8] sm:$0xff] }
 0x145   : > { %v977_v60 = vmax.f32 %v945_v54, 0.0  ;;  %v946_v62 = vadd.f32 %v1934_v15, %v907_v58  ;;  %874 = vst.msk [vmem:[#allocation2 + $0xf8] sm:$0xff] %vm264_vm0, %v841_v56  ;;  %v1378_v63 = vpack.c.bf16 %v961_v59, %v961_v59  ;;  %v962_v1 = vmax.f32 %v930_v61, 0.0 }
 0x147   : > { %v1394_v0 = vpack.c.bf16 %v977_v60, %v977_v60  ;;  %v978_v2 = vmax.f32 %v946_v62, 0.0  ;;  %1122 = vst.msk [vmem:[%s1949_s7 + $0x30] sm:$0xf] %vm1109_vm1, %v1378_v63  ;;  %v1379_v3 = vpack.c.bf16 %v962_v1, %v962_v1  ;;  %v892_v5 = vld [vmem:[#allocation2 + $0x70] sm:$0xff] }
 0x148   : > { %v931_v7 = vadd.f32 %v1934_v15, %v892_v5 }
 0x149   : > { %1138 = vst.msk [vmem:[%s1949_s7 + $0x70] sm:$0xf] %vm1109_vm1, %v1394_v0  ;;  %v1395_v4 = vpack.c.bf16 %v978_v2, %v978_v2  ;;  %1123 = vst.msk [vmem:[%s1949_s7 + $0x34] sm:$0xf] %vm1109_vm1, %v1379_v3 }
 0x14a   : > { %v908_v6 = vld [vmem:[#allocation2 + $0xf0] sm:$0xff]  ;;  %v893_v9 = vld [vmem:[#allocation2 + $0x78] sm:$0xff]  ;;  %v963_v11 = vmax.f32 %v931_v7, 0.0 }
 0x14b   : > { %1139 = vst.msk [vmem:[%s1949_s7 + $0x74] sm:$0xf] %vm1109_vm1, %v1395_v4  ;;  %v947_v8 = vadd.f32 %v1934_v15, %v908_v6  ;;  %v932_v13 = vadd.f32 %v1934_v15, %v893_v9 }
 0x14c   : > { %v909_v10 = vld [vmem:[#allocation2 + $0xf8] sm:$0xff]  ;;  %v1380_v16 = vpack.c.bf16 %v963_v11, %v963_v11 }
 0x14d   : > { %v979_v12 = vmax.f32 %v947_v8, 0.0  ;;  %v948_v14 = vadd.f32 %v1934_v15, %v909_v10  ;;  %v964_v18 = vmax.f32 %v932_v13, 0.0 }
 0x14e   : > { %1124 = vst.msk [vmem:[%s1949_s7 + $0x38] sm:$0xf] %vm1109_vm1, %v1380_v16 }
 0x14f   : > { %v1396_v17 = vpack.c.bf16 %v979_v12, %v979_v12  ;;  %v980_v19 = vmax.f32 %v948_v14, 0.0  ;;  %v1381_v15 = vpack.c.bf16 %v964_v18, %v964_v18 }
 0x151   : > { %1140 = vst.msk [vmem:[%s1949_s7 + $0x78] sm:$0xf] %vm1109_vm1, %v1396_v17  ;;  %v1397_v20 = vpack.c.bf16 %v980_v19, %v980_v19  ;;  %1125 = vst.msk [vmem:[%s1949_s7 + $0x3c] sm:$0xf] %vm1109_vm1, %v1381_v15 }
 0x153   : > { %1141 = vst.msk [vmem:[%s1949_s7 + $0x7c] sm:$0xf] %vm1109_vm1, %v1397_v20 }
 0x154   : > { %1662 = shalt.err (!%p1659_p5)
}
 0x155   : > { %s1663_s26 = scalar_lea.hbm %s2064_s11, 2048  ;;  %s1667_s30 = scalar_lea.hbm %s2127_s3, 16384 }
 0x156   : > { %p1664_p6 = scmp.ne.s32.totalorder %s2064_s11, %s1663_s26  ;;  %p1668_p10 = scmp.lt.u32.totalorder %s2064_s11, %s2127_s3 }
 0x157   : > { %p1669_p11 = scmp.lt.u32.totalorder %s1667_s30, %s1663_s26  ;;  %p1671_p13 = scmp.lt.u32.totalorder %s1663_s26, %s2064_s11 }
 0x158   : > { %p1665_p7 = pnand %p1664_p6, %p1793_p4 }
 0x159   : > { %p1670_p12 = por %p1669_p11, %p1668_p10 }
 0x15a   : > { %p1666_p9 = pneg %p1665_p7 }
 0x15b   : > { %p1672_p0 = por %p1671_p13, %p1670_p12 }
 0x15d   : > { %p1673_p1 = pnand %p1672_p0, %p1666_p9 }
 0x15f   : > { %1676 = shalt.err (!%p1673_p1)
}
 0x160   : > { %s1731_s6 = smov 64   ;;  %s1732_s7 = smov 4  }
 0x161   : > { %1527 = dma.vmem_to_hbm [thread:$0]  (%p1793_p4), %s2066_s8, 2048, %s2064_s11, %s2078_s15, %s1731_s6, %s1731_s6, %s1732_s7  }
 0x162 PF: > { %p1533_p2 = scmp.ge.s32.totalorder %s1727_s17, 2  ;;  %s1172_s28 = sand.u32 1, %s1707_s12  }
 0x163   : > { %s1173_s9 = scalar_lea.sflag [#allocation4], %s1172_s28 }
 0x164   : > { %p1530_p3 = pnand %p1533_p2, %p1800_p8 }
 0x166   : > { %1702 = dma.done.wait (!%p1530_p3), %s1173_s9, 2048  }
 0x167   : > { %1704 = vsyncadd (!%p1530_p3), %s1173_s9, 4294965248  ;;  %s16_s17 = sadd.s32 1, %s1727_s17   ;;  %s2130_s12 = smov %s1711_s13 }
 0x168   : > { %p13_p5 = scmp.ge.s32.totalorder %s16_s17, 10   ;;  %s2131_s13 = smov %s1715_s14 }
 0x169   : > { %s2132_s14 = smov %s1806_s25  ;;  %s2133_s15 = smov %s1723_s16 }
 0x16a   : > { %s2134_s16 = smov %s2136_s20  ;;  %15 = sbr.rel (!%p13_p5) target bundleno = 4 (0x4), region = 81 }
 0x171   :  { %1178 = vsyncpa [#allocation4], 1 }
 0x172   :  { %1180 = vsyncpa [#allocation4 + $0x1], 1 }

</bundles_post_ra>
